<compile_context>
chip_gen: v5e
topology: v5e:2x2
jax: 0.10.0
libtpu: 0.0.40
codegen_flags: <defaults>
</compile_context>

<pallas_src>
import jax
import jax.numpy as jnp
from jax.experimental import pallas as pl
from jax.experimental.pallas import tpu as pltpu

IN_FEATURES = 28 * 28      # 784
HIDDEN = 256
NUM_CLASSES = 10
PADDED_CLASSES = 128       # lane-dense width for in-kernel logits / softmax only
TILE_B_DEFAULT = 2048      # batch rows per grid step (sweep 1024/2048/4096)


def _round_up(x, m):
    return ((x + m - 1) // m) * m


def _choose_tile_b(batch, tile_b):
    """Batch tile: multiple of 8 (sublane) and capped so small/medium batches
    still produce >= 2 grid steps (lets v7x split the grid across 2 TCs)."""
    if batch <= 8:
        return batch                               # single block; equals full batch dim
    two_way = _round_up(-(-batch // 2), 8)          # ceil(batch/2) rounded up to 8
    return max(8, min(tile_b, two_way))


def _mlp_softmax_kernel(x_ref, w1_ref, b1_ref, w2_ref, b2_ref, out_ref):
    # x_ref:  (TB, 784) f32     w1_ref: (784, 256) bf16   b1_ref: (1, 256) f32
    # w2_ref: (256, 128) bf16   b2_ref: (1, 128)   f32    out_ref: (TB, 10) f32
    x = x_ref[...].astype(jnp.bfloat16)          # in-kernel cast (VPU has slack)

    # Linear 1 + ReLU: bf16 MXU matmul with f32 accumulation; epilogue in f32.
    h = jnp.dot(x, w1_ref[...], preferred_element_type=jnp.float32)
    h = jnp.maximum(h + b1_ref[...], 0.0)

    # Linear 2 on the 128-padded class dim (padded cols: zero weight, -1e30 bias).
    logits = jnp.dot(h.astype(jnp.bfloat16), w2_ref[...],
                     preferred_element_type=jnp.float32) + b2_ref[...]

    # Numerically stable row softmax; padded columns exp() to exactly 0.
    m = jnp.max(logits, axis=-1, keepdims=True)
    e = jnp.exp(logits - m)
    denom = jnp.sum(e, axis=-1, keepdims=True)
    probs = e / denom                            # exact normalization

    # Store only the 10 real classes (narrow output, no wrapper-side slice pass).
    out_ref[...] = probs[:, :NUM_CLASSES].astype(out_ref.dtype)


def feed_forward_net(x_nchw, w1, b1, w2, b2, *, tile_b=TILE_B_DEFAULT):
    """Forward pass matching the PyTorch FeedForwardNet.

    x_nchw: (B, 1, 28, 28) float32
    w1: (784, 256), b1: (256,), w2: (256, 10), b2: (10,)
    returns: (B, 10) softmax probabilities (float32)
    """
    B = x_nchw.shape[0]
    # nn.Flatten (row-major); no dtype cast here -- the bf16 cast is in-kernel.
    x_flat = x_nchw.reshape(B, IN_FEATURES).astype(jnp.float32)

    tb = _choose_tile_b(B, tile_b)
    grid = (pl.cdiv(B, tb),)                     # ragged last block handled by Pallas

    # Weight prep: bf16 MXU operands; class dim padded to 128 lanes so the
    # in-kernel softmax reductions are lane-dense (padded cols contribute 0).
    w1_bf = w1.astype(jnp.bfloat16)
    w2_p = jnp.zeros((HIDDEN, PADDED_CLASSES), jnp.bfloat16)
    w2_p = w2_p.at[:, :NUM_CLASSES].set(w2.astype(jnp.bfloat16))
    b1_2d = b1.reshape(1, HIDDEN).astype(jnp.float32)
    b2_p = jnp.full((1, PADDED_CLASSES), -1e30, jnp.float32)
    b2_p = b2_p.at[0, :NUM_CLASSES].set(b2.astype(jnp.float32))

    weight_bytes = (IN_FEATURES * HIDDEN + HIDDEN * PADDED_CLASSES) * 2 \
        + (HIDDEN + PADDED_CLASSES) * 4
    cost = pl.CostEstimate(
        flops=2 * B * (IN_FEATURES * HIDDEN + HIDDEN * PADDED_CLASSES),
        transcendentals=B * PADDED_CLASSES,
        bytes_accessed=B * (IN_FEATURES + NUM_CLASSES) * 4 + weight_bytes,
    )

    return pl.pallas_call(
        _mlp_softmax_kernel,
        out_shape=jax.ShapeDtypeStruct((B, NUM_CLASSES), jnp.float32),
        grid=grid,
        in_specs=[
            pl.BlockSpec((tb, IN_FEATURES), lambda i: (i, 0)),          # x: streamed (f32)
            pl.BlockSpec((IN_FEATURES, HIDDEN), lambda i: (0, 0)),      # w1: VMEM-resident
            pl.BlockSpec((1, HIDDEN), lambda i: (0, 0)),                # b1: resident
            pl.BlockSpec((HIDDEN, PADDED_CLASSES), lambda i: (0, 0)),   # w2: resident
            pl.BlockSpec((1, PADDED_CLASSES), lambda i: (0, 0)),        # b2: resident
        ],
        out_specs=pl.BlockSpec((tb, NUM_CLASSES), lambda i: (i, 0)),
        compiler_params=pltpu.CompilerParams(
            # Sweep note: pltpu.CORE_PARALLEL on this axis is worth trying on v7x;
            # "parallel" kept here for portability across v5e/v6e/v7x.
            dimension_semantics=("parallel",),
            # TB=2048 f32 x double-buffers (~12.5 MiB) + resident weights +
            # intermediates stay well inside this even on v7x (64 MiB per TC).
            vmem_limit_bytes=48 * 1024 * 1024,
        ),
        cost_estimate=cost,
    )(x_flat, w1_bf, b1_2d, w2_p, b2_p)


def init_params(key):
    """Deterministic init mimicking PyTorch's default Linear init
    (uniform in +-1/sqrt(fan_in))."""
    k1, k2, k3, k4 = jax.random.split(key, 4)
    bound1 = 1.0 / jnp.sqrt(IN_FEATURES)
    bound2 = 1.0 / jnp.sqrt(HIDDEN)
    w1 = jax.random.uniform(k1, (IN_FEATURES, HIDDEN), jnp.float32, -bound1, bound1)
    b1 = jax.random.uniform(k2, (HIDDEN,), jnp.float32, -bound1, bound1)
    w2 = jax.random.uniform(k3, (HIDDEN, NUM_CLASSES), jnp.float32, -bound2, bound2)
    b2 = jax.random.uniform(k4, (NUM_CLASSES,), jnp.float32, -bound2, bound2)
    return w1, b1, w2, b2


if __name__ == "__main__":
    key = jax.random.PRNGKey(0)
    k_in, k_params = jax.random.split(key)
    w1, b1, w2, b2 = init_params(k_params)

    # B=8: single full block.  B=13: exercises the ragged last block (no jnp.pad).
    for batch in (8, 13):
        x = jax.random.normal(jax.random.fold_in(k_in, batch),
                              (batch, 1, 28, 28), jnp.float32)
        probs = jax.block_until_ready(feed_forward_net(x, w1, b1, w2, b2))

        # Pure-JAX f32 reference (tolerance relaxed for bf16 MXU inputs).
        x_flat = x.reshape(batch, -1)
        h_ref = jnp.maximum(x_flat @ w1 + b1, 0.0)
        probs_ref = jax.nn.softmax(h_ref @ w2 + b2, axis=1)

        assert probs.shape == (batch, NUM_CLASSES)
        assert jnp.allclose(jnp.sum(probs, axis=1), 1.0, atol=1e-3)
        assert jnp.allclose(probs, probs_ref, atol=2e-2)

    print("KERNEL_OK")
</pallas_src>

<mosaic_0001>
module attributes {stable_mosaic.version = 11 : i64} {
  func.func @_mlp_softmax_kernel(%arg0: i32, %arg1: memref<8x784xf32, #tpu.memory_space<vmem>>, %arg2: memref<784x256xbf16, #tpu.memory_space<vmem>>, %arg3: memref<1x256xf32, #tpu.memory_space<vmem>>, %arg4: memref<256x128xbf16, #tpu.memory_space<vmem>>, %arg5: memref<1x128xf32, #tpu.memory_space<vmem>>, %arg6: memref<8x10xf32, #tpu.memory_space<vmem>>) attributes {dimension_semantics = [#tpu.dimension_semantics<parallel>], iteration_bounds = array<i64: 1>, scalar_prefetch = 0 : i64, scratch_operands = 0 : i64, tpu.core_type = #tpu.core_type<tc>, window_params = [{transform_indices = @transform_0, window_bounds = array<i64: 8, 784>}, {pipeline_mode = #tpu.pipeline_mode<synchronous>, transform_indices = @transform_1, window_bounds = array<i64: 784, 256>}, {pipeline_mode = #tpu.pipeline_mode<synchronous>, transform_indices = @transform_2, window_bounds = array<i64: 1, 256>}, {pipeline_mode = #tpu.pipeline_mode<synchronous>, transform_indices = @transform_3, window_bounds = array<i64: 256, 128>}, {pipeline_mode = #tpu.pipeline_mode<synchronous>, transform_indices = @transform_4, window_bounds = array<i64: 1, 128>}, {transform_indices = @transform_5, window_bounds = array<i64: 8, 10>}]} {
    %c0 = arith.constant 0 : index
    %c0_0 = arith.constant 0 : index
    %0 = vector.load %arg1[%c0, %c0_0] : memref<8x784xf32, #tpu.memory_space<vmem>>, vector<8x784xf32>
    %1 = arith.truncf %0 : vector<8x784xf32> to vector<8x784xbf16>
    %c0_1 = arith.constant 0 : index
    %c0_2 = arith.constant 0 : index
    %2 = vector.load %arg2[%c0_1, %c0_2] : memref<784x256xbf16, #tpu.memory_space<vmem>>, vector<784x256xbf16>
    %cst = arith.constant dense<0.000000e+00> : vector<8x256xf32>
    %3 = tpu.matmul %1, %2, %cst {dimension_numbers = #tpu.dot_dimension_numbers<[1], [0], [0], [1], [0, 0, 1, 1], [], []>} : vector<8x784xbf16>, vector<784x256xbf16>, vector<8x256xf32> -> vector<8x256xf32>
    %c0_3 = arith.constant 0 : index
    %c0_4 = arith.constant 0 : index
    %4 = vector.load %arg3[%c0_3, %c0_4] : memref<1x256xf32, #tpu.memory_space<vmem>>, vector<1x256xf32>
    %5 = vector.broadcast %4 : vector<1x256xf32> to vector<8x256xf32>
    %6 = arith.addf %3, %5 : vector<8x256xf32>
    %cst_5 = arith.constant 0.000000e+00 : f32
    %7 = vector.broadcast %cst_5 : f32 to vector<8x256xf32>
    %8 = arith.maximumf %6, %7 : vector<8x256xf32>
    %9 = arith.truncf %8 : vector<8x256xf32> to vector<8x256xbf16>
    %c0_6 = arith.constant 0 : index
    %c0_7 = arith.constant 0 : index
    %10 = vector.load %arg4[%c0_6, %c0_7] : memref<256x128xbf16, #tpu.memory_space<vmem>>, vector<256x128xbf16>
    %cst_8 = arith.constant dense<0.000000e+00> : vector<8x128xf32>
    %11 = tpu.matmul %9, %10, %cst_8 {dimension_numbers = #tpu.dot_dimension_numbers<[1], [0], [0], [1], [0, 0, 1, 1], [], []>} : vector<8x256xbf16>, vector<256x128xbf16>, vector<8x128xf32> -> vector<8x128xf32>
    %c0_9 = arith.constant 0 : index
    %c0_10 = arith.constant 0 : index
    %12 = vector.load %arg5[%c0_9, %c0_10] : memref<1x128xf32, #tpu.memory_space<vmem>>, vector<1x128xf32>
    %13 = vector.broadcast %12 : vector<1x128xf32> to vector<8x128xf32>
    %14 = arith.addf %11, %13 : vector<8x128xf32>
    %cst_11 = arith.constant dense<0xFF800000> : vector<8xf32>
    %15 = vector.multi_reduction <maximumf>, %14, %cst_11 [1] : vector<8x128xf32> to vector<8xf32>
    %16 = vector.shape_cast %15 : vector<8xf32> to vector<8x1xf32>
    %17 = vector.broadcast %16 : vector<8x1xf32> to vector<8x128xf32>
    %18 = arith.subf %14, %17 : vector<8x128xf32>
    %19 = math.exp %18 : vector<8x128xf32>
    %cst_12 = arith.constant dense<0.000000e+00> : vector<8xf32>
    %20 = vector.multi_reduction <add>, %19, %cst_12 [1] : vector<8x128xf32> to vector<8xf32>
    %21 = vector.shape_cast %20 : vector<8xf32> to vector<8x1xf32>
    %22 = vector.broadcast %21 : vector<8x1xf32> to vector<8x128xf32>
    %23 = arith.divf %19, %22 : vector<8x128xf32>
    %24 = vector.extract_strided_slice %23 {offsets = [0, 0], sizes = [8, 10], strides = [1, 1]} : vector<8x128xf32> to vector<8x10xf32>
    %c0_13 = arith.constant 0 : index
    %c0_14 = arith.constant 0 : index
    %25 = vector.load %arg6[%c0_13, %c0_14] : memref<8x10xf32, #tpu.memory_space<vmem>>, vector<8x10xf32>
    tpu.vector_store %arg6[%c0_13, %c0_14], %24 {strides = array<i32>} : memref<8x10xf32, #tpu.memory_space<vmem>>, vector<8x10xf32>,
    return
  }
  func.func @transform_0(%arg0: i32) -> (i32, i32) {
    %c0_i32 = arith.constant 0 : i32
    %c0_i32_0 = arith.constant 0 : i32
    return %arg0, %c0_i32 : i32, i32
  }
  func.func @transform_1(%arg0: i32) -> (i32, i32) {
    %c0_i32 = arith.constant 0 : i32
    %c0_i32_0 = arith.constant 0 : i32
    %c0_i32_1 = arith.constant 0 : i32
    return %c0_i32, %c0_i32_0 : i32, i32
  }
  func.func @transform_2(%arg0: i32) -> (i32, i32) {
    %c0_i32 = arith.constant 0 : i32
    %c0_i32_0 = arith.constant 0 : i32
    %c0_i32_1 = arith.constant 0 : i32
    return %c0_i32, %c0_i32_0 : i32, i32
  }
  func.func @transform_3(%arg0: i32) -> (i32, i32) {
    %c0_i32 = arith.constant 0 : i32
    %c0_i32_0 = arith.constant 0 : i32
    %c0_i32_1 = arith.constant 0 : i32
    return %c0_i32, %c0_i32_0 : i32, i32
  }
  func.func @transform_4(%arg0: i32) -> (i32, i32) {
    %c0_i32 = arith.constant 0 : i32
    %c0_i32_0 = arith.constant 0 : i32
    %c0_i32_1 = arith.constant 0 : i32
    return %c0_i32, %c0_i32_0 : i32, i32
  }
  func.func @transform_5(%arg0: i32) -> (i32, i32) {
    %c0_i32 = arith.constant 0 : i32
    %c0_i32_0 = arith.constant 0 : i32
    return %arg0, %c0_i32 : i32, i32
  }
}

</mosaic_0001>

<bundles_post_ra>
// kernel: tpu_custom_call.1
= control target key start
LH: loop header
LB: loop body
LE: loop exit
PB: predicated region body
PF: predicated region fallthrough
CT: control target
= control target key end

     0   :  { %10 = vsyncpa [#allocation3], 0  ;;  %s1881_s0 = inlined_call_operand.hbm [shape: f32[8,784], index: 0, kind: input, shape index: {}]   ;;  %s1882_s1 = inlined_call_operand.hbm [shape: bf16[784,256], index: 1, kind: input, shape index: {}]   ;;  %s1883_s2 = inlined_call_operand.hbm [shape: f32[1,256], index: 2, kind: input, shape index: {}]   ;;  %s1884_s3 = inlined_call_operand.hbm [shape: bf16[256,128], index: 3, kind: input, shape index: {}]   ;;  %s1885_s4 = inlined_call_operand.vmem [shape: f32[1,128], index: 4, kind: input, shape index: {}]   ;;  %s1886_s5 = inlined_call_operand.hbm [shape: f32[8,10], index: 5, kind: output, shape index: {}]  }
   0x1   :  { %11 = vsyncpa [#allocation6], 0 }
   0x2   :  { %12 = vsyncpa [#allocation9], 0  ;;  %s29_s20 = sshll.u32 %s1882_s1, 4  ;;  %s30_s20 = int_to_ptr.hbm [resolvable:$true] %s29_s20 }
   0x3   :  { %13 = vsyncpa [#allocation4], 0  ;;  %s1794_s21 = smov [#allocation5]   ;;  %s19_s25 = sshll.u32 %s1881_s0, 4  ;;  %s20_s25 = int_to_ptr.hbm [resolvable:$true] %s19_s25 }
   0x4   :  { %s31_s22 = sshll.u32 %s1794_s21, 4  ;;  %s1795_s26 = smov 128   ;;  %s32_s22 = int_to_ptr.vmem [resolvable:$true] %s31_s22 }
   0x5   :  { %s1796_s27 = smov 8   ;;  %s1797_s28 = smov [#allocation2]  }
   0x6   :  { %37 = dma.hbm_to_vmem [thread:$0]  %s30_s20, 12544, %s32_s22, [#allocation6], %s1795_s26, %s1795_s26, %s1796_s27  }
   0x7   :  { %s21_s29 = sshll.u32 %s1797_s28, 4  ;;  %s43_s7 = sshll.u32 %s1883_s2, 4  ;;  %s22_s29 = int_to_ptr.vmem [resolvable:$true] %s21_s29  ;;  %s44_s7 = int_to_ptr.hbm [resolvable:$true] %s43_s7 }
   0x8   :  { %24 = dma.hbm_to_vmem [thread:$0]  %s20_s25, 896, %s22_s29, [#allocation3]  }
   0x9   :  { %s53_s9 = sshll.u32 %s1884_s3, 4  ;;  %s1798_s10 = smov [#allocation7]   ;;  %s54_s9 = int_to_ptr.hbm [resolvable:$true] %s53_s9 }
   0xa   :  { %s45_s11 = sshll.u32 %s1798_s10, 4  ;;  %s1799_s0 = smov [#allocation8]   ;;  %s46_s11 = int_to_ptr.vmem [resolvable:$true] %s45_s11 }
   0xb   :  { %48 = dma.hbm_to_vmem [thread:$0]  %s44_s7, 32, %s46_s11, [#allocation6]  }
   0xc   :  { %s55_s12 = sshll.u32 %s1799_s0, 4  ;;  %s1800_s13 = smov 64   ;;  %s56_s12 = int_to_ptr.vmem [resolvable:$true] %s55_s12 }
   0xd   :  { %s1801_s14 = smov 4  }
   0xe   :  { %61 = dma.hbm_to_vmem [thread:$0]  %s54_s9, 2048, %s56_s12, [#allocation9], %s1800_s13, %s1800_s13, %s1801_s14  }
   0xf   :  { %1786 = dma.done.wait [#allocation3], 896  }
  0x10   :  { %1787 = vsyncadd [#allocation3], 4294966400 }
  0x11   :  { %1788 = dma.done.wait [#allocation6], 12576  }
  0x12   :  { %1789 = vsyncadd [#allocation6], 4294954720 }
  0x13   :  { %1790 = dma.done.wait [#allocation9], 2048  }
  0x14   :  { %1791 = vsyncadd [#allocation9], 4294965248  ;;  %v1138_v0 = vld [vmem:[#allocation5 + $0x70] sm:$0xf]  ;;  %v1553_v1 = vld [vmem:[#allocation5 + $0x74] sm:$0xf0] }
  0x15   :  { %v1266_v2 = vld [vmem:[#allocation5 + $0x170] sm:$0xf]  ;;  %v1139_v3 = vor.u32 %v1553_v1, %v1138_v0  ;;  %v1585_v4 = vld [vmem:[#allocation5 + $0x174] sm:$0xf0]  ;;  %v1130_v11 = vld [vmem:[#allocation5 + $0x60] sm:$0xf] }
  0x16   :  { %v1330_v5 = vld [vmem:[#allocation5 + $0x1f0] sm:$0xf]  ;;  %v1601_v6 = vld [vmem:[#allocation5 + $0x1f4] sm:$0xf0]  ;;  %v1267_v7 = vor.u32 %v1585_v4, %v1266_v2  ;;  %v1551_v13 = vld [vmem:[#allocation5 + $0x64] sm:$0xf0] }
  0x17   :  { %v1331_v8 = vor.u32 %v1601_v6, %v1330_v5  ;;  %v1202_v9 = vld [vmem:[#allocation5 + $0xf0] sm:$0xf]  ;;  %v1569_v10 = vld [vmem:[#allocation5 + $0xf4] sm:$0xf0]  ;;  %693 = vmatpush.bf16.msra.mxu0 %v1139_v3  ;;  %v1258_v14 = vld [vmem:[#allocation5 + $0x160] sm:$0xf]  ;;  %v1131_v16 = vor.u32 %v1551_v13, %v1130_v11 }
  0x18   :  { %v1203_v12 = vor.u32 %v1569_v10, %v1202_v9  ;;  %v1583_v15 = vld [vmem:[#allocation5 + $0x164] sm:$0xf0]  ;;  %719 = vmatpush.bf16.msra.mxu2 %v1267_v7  ;;  %v1322_v18 = vld [vmem:[#allocation5 + $0x1e0] sm:$0xf]  ;;  %v1122_v23 = vld [vmem:[#allocation5 + $0x50] sm:$0xf] }
  0x19   :  { %732 = vmatpush.bf16.msra.mxu3 %v1331_v8  ;;  %v1259_v17 = vor.u32 %v1583_v15, %v1258_v14  ;;  %v1599_v19 = vld [vmem:[#allocation5 + $0x1e4] sm:$0xf0]  ;;  %v1194_v20 = vld [vmem:[#allocation5 + $0xe0] sm:$0xf]  ;;  %v1549_v24 = vld [vmem:[#allocation5 + $0x54] sm:$0xf0] }
  0x1a   :  { %706 = vmatpush.bf16.msra.mxu1 %v1203_v12  ;;  %v1323_v21 = vor.u32 %v1599_v19, %v1322_v18  ;;  %v1567_v22 = vld [vmem:[#allocation5 + $0xe4] sm:$0xf0]  ;;  %v1250_v26 = vld [vmem:[#allocation5 + $0x150] sm:$0xf]  ;;  %v1581_v27 = vld [vmem:[#allocation5 + $0x154] sm:$0xf0]  ;;  %v1123_v29 = vor.u32 %v1549_v24, %v1122_v23 }
  0x1b   :  { %v1195_v25 = vor.u32 %v1567_v22, %v1194_v20  ;;  %v1314_v28 = vld [vmem:[#allocation5 + $0x1d0] sm:$0xf]  ;;  %694 = vmatpush.bf16.msra.mxu0 %v1131_v16  ;;  %v1597_v30 = vld [vmem:[#allocation5 + $0x1d4] sm:$0xf0]  ;;  %v1251_v33 = vor.u32 %v1581_v27, %v1250_v26  ;;  %v1114_v35 = vld [vmem:[#allocation5 + $0x40] sm:$0xf] }
  0x1c   :  { %v1186_v31 = vld [vmem:[#allocation5 + $0xd0] sm:$0xf]  ;;  %v1565_v32 = vld [vmem:[#allocation5 + $0xd4] sm:$0xf0]  ;;  %720 = vmatpush.bf16.msra.mxu2 %v1259_v17  ;;  %v1315_v34 = vor.u32 %v1597_v30, %v1314_v28  ;;  %v1547_v36 = vld [vmem:[#allocation5 + $0x44] sm:$0xf0] }
  0x1d   :  { %733 = vmatpush.bf16.msra.mxu3 %v1323_v21  ;;  %v1242_v37 = vld [vmem:[#allocation5 + $0x140] sm:$0xf]  ;;  %v1187_v38 = vor.u32 %v1565_v32, %v1186_v31  ;;  %v1579_v39 = vld [vmem:[#allocation5 + $0x144] sm:$0xf0]  ;;  %v1115_v44 = vor.u32 %v1547_v36, %v1114_v35  ;;  %v1106_v47 = vld [vmem:[#allocation5 + $0x30] sm:$0xf] }
  0x1e   :  { %707 = vmatpush.bf16.msra.mxu1 %v1195_v25  ;;  %v1306_v40 = vld [vmem:[#allocation5 + $0x1c0] sm:$0xf]  ;;  %v1595_v41 = vld [vmem:[#allocation5 + $0x1c4] sm:$0xf0]  ;;  %v1243_v45 = vor.u32 %v1579_v39, %v1242_v37  ;;  %v1545_v48 = vld [vmem:[#allocation5 + $0x34] sm:$0xf0] }
  0x1f   :  { %v1178_v42 = vld [vmem:[#allocation5 + $0xc0] sm:$0xf]  ;;  %v1563_v43 = vld [vmem:[#allocation5 + $0xc4] sm:$0xf0]  ;;  %695 = vmatpush.bf16.msra.mxu0 %v1123_v29  ;;  %v1307_v46 = vor.u32 %v1595_v41, %v1306_v40  ;;  %v1234_v49 = vld [vmem:[#allocation5 + $0x130] sm:$0xf]  ;;  %v1107_v56 = vor.u32 %v1545_v48, %v1106_v47 }
  0x20   :  { %721 = vmatpush.bf16.msra.mxu2 %v1251_v33  ;;  %v1179_v50 = vor.u32 %v1563_v43, %v1178_v42  ;;  %v1577_v51 = vld [vmem:[#allocation5 + $0x134] sm:$0xf0]  ;;  %v1298_v52 = vld [vmem:[#allocation5 + $0x1b0] sm:$0xf]  ;;  %v1098_v59 = vld [vmem:[#allocation5 + $0x20] sm:$0xf] }
  0x21   :  { %734 = vmatpush.bf16.msra.mxu3 %v1315_v34  ;;  %v1593_v53 = vld [vmem:[#allocation5 + $0x1b4] sm:$0xf0]  ;;  %v1170_v54 = vld [vmem:[#allocation5 + $0xb0] sm:$0xf]  ;;  %v1235_v57 = vor.u32 %v1577_v51, %v1234_v49  ;;  %v1543_v60 = vld [vmem:[#allocation5 + $0x24] sm:$0xf0] }
  0x22   :  { %708 = vmatpush.bf16.msra.mxu1 %v1187_v38  ;;  %v1561_v55 = vld [vmem:[#allocation5 + $0xb4] sm:$0xf0]  ;;  %v1299_v58 = vor.u32 %v1593_v53, %v1298_v52  ;;  %v1226_v61 = vld [vmem:[#allocation5 + $0x120] sm:$0xf]  ;;  %v1575_v63 = vld [vmem:[#allocation5 + $0x124] sm:$0xf0]  ;;  %v1099_v4 = vor.u32 %v1543_v60, %v1098_v59 }
  0x23   :  { %696 = vmatpush.bf16.msra.mxu0 %v1115_v44  ;;  %v1171_v62 = vor.u32 %v1561_v55, %v1170_v54  ;;  %v1290_v0 = vld [vmem:[#allocation5 + $0x1a0] sm:$0xf]  ;;  %v1591_v1 = vld [vmem:[#allocation5 + $0x1a4] sm:$0xf0]  ;;  %v1227_v5 = vor.u32 %v1575_v63, %v1226_v61  ;;  %v1090_v7 = vld [vmem:[#allocation5 + $0x10] sm:$0xf] }
  0x24   :  { %722 = vmatpush.bf16.msra.mxu2 %v1243_v45  ;;  %v1162_v2 = vld [vmem:[#allocation5 + $0xa0] sm:$0xf]  ;;  %v1559_v3 = vld [vmem:[#allocation5 + $0xa4] sm:$0xf0]  ;;  %v1291_v6 = vor.u32 %v1591_v1, %v1290_v0  ;;  %v1541_v8 = vld [vmem:[#allocation5 + $0x14] sm:$0xf0] }
  0x25   :  { %735 = vmatpush.bf16.msra.mxu3 %v1307_v46  ;;  %v1218_v9 = vld [vmem:[#allocation5 + $0x110] sm:$0xf]  ;;  %v1163_v10 = vor.u32 %v1559_v3, %v1162_v2  ;;  %v1573_v11 = vld [vmem:[#allocation5 + $0x114] sm:$0xf0]  ;;  %v1091_v16 = vor.u32 %v1541_v8, %v1090_v7  ;;  %v1082_v17 = vld [vmem:[#allocation5] sm:$0xf] }
  0x26   :  { %709 = vmatpush.bf16.msra.mxu1 %v1179_v50  ;;  %v1282_v12 = vld [vmem:[#allocation5 + $0x190] sm:$0xf]  ;;  %v1589_v13 = vld [vmem:[#allocation5 + $0x194] sm:$0xf0]  ;;  %v1539_v18 = vld [vmem:[#allocation5 + $0x4] sm:$0xf0]  ;;  %v1219_v20 = vor.u32 %v1573_v11, %v1218_v9 }
  0x27   :  { %697 = vmatpush.bf16.msra.mxu0 %v1107_v56  ;;  %v1154_v14 = vld [vmem:[#allocation5 + $0x90] sm:$0xf]  ;;  %v1557_v15 = vld [vmem:[#allocation5 + $0x94] sm:$0xf0]  ;;  %v1210_v19 = vld [vmem:[#allocation5 + $0x100] sm:$0xf]  ;;  %v1283_v21 = vor.u32 %v1589_v13, %v1282_v12  ;;  %v1083_v32 = vor.u32 %v1539_v18, %v1082_v17 }
  0x28   :  { %723 = vmatpush.bf16.msra.mxu2 %v1235_v57  ;;  %v1571_v22 = vld [vmem:[#allocation5 + $0x104] sm:$0xf0]  ;;  %v1274_v23 = vld [vmem:[#allocation5 + $0x180] sm:$0xf]  ;;  %v1155_v25 = vor.u32 %v1557_v15, %v1154_v14  ;;  %v1394_v26 = vld [vmem:[#allocation5 + $0x270] sm:$0xf] }
  0x29   :  { %736 = vmatpush.bf16.msra.mxu3 %v1299_v58  ;;  %v1587_v24 = vld [vmem:[#allocation5 + $0x184] sm:$0xf0]  ;;  %v1617_v27 = vld [vmem:[#allocation5 + $0x274] sm:$0xf0]  ;;  %v1552_v28 = vld [vmem:[#allocation5 + $0x74] sm:$0xf]  ;;  %v1211_v36 = vor.u32 %v1571_v22, %v1210_v19 }
  0x2a   :  { %710 = vmatpush.bf16.msra.mxu1 %v1171_v62  ;;  %v1140_v29 = vld [vmem:[#allocation5 + $0x78] sm:$0xf0]  ;;  %v1146_v30 = vld [vmem:[#allocation5 + $0x80] sm:$0xf]  ;;  %v1555_v31 = vld [vmem:[#allocation5 + $0x84] sm:$0xf0]  ;;  %v1275_v37 = vor.u32 %v1587_v24, %v1274_v23  ;;  %v1395_v41 = vor.u32 %v1617_v27, %v1394_v26 }
  0x2b   :  { %698 = vmatpush.bf16.msra.mxu0 %v1099_v4  ;;  %v83_v33 = vld [vmem:[#allocation2 + $0x10] sm:$0xff]  ;;  %v1466_v34 = vld [vmem:[#allocation5 + $0x300] sm:$0xf]  ;;  %v1635_v35 = vld [vmem:[#allocation5 + $0x304] sm:$0xf0]  ;;  %v1143_v42 = vor.u32 %v1552_v28, %v1140_v29  ;;  %v1147_v46 = vor.u32 %v1555_v31, %v1146_v30  ;;  %vm689_vm0 = vcmask 130048  }
  0x2c   :  { %724 = vmatpush.bf16.msra.mxu2 %v1227_v5  ;;  %v1458_v38 = vld [vmem:[#allocation5 + $0x2f0] sm:$0xf]  ;;  %v1633_v39 = vld [vmem:[#allocation5 + $0x2f4] sm:$0xf0]  ;;  %v1568_v40 = vld [vmem:[#allocation5 + $0xf4] sm:$0xf]  ;;  %v1467_v47 = vor.u32 %v1635_v35, %v1466_v34  ;;  %v1845_v51 = vpack.c.bf16 %v83_v33, %v83_v33 }
  0x2d   :  { %737 = vmatpush.bf16.msra.mxu3 %v1291_v6  ;;  %v1204_v43 = vld [vmem:[#allocation5 + $0xf8] sm:$0xf0]  ;;  %v1386_v44 = vld [vmem:[#allocation5 + $0x260] sm:$0xf]  ;;  %v81_v45 = vld [vmem:[#allocation2] sm:$0xff]  ;;  %v1459_v52 = vor.u32 %v1633_v39, %v1458_v38  ;;  %s1068_s18 = sshll.u32 %s1886_s5, 4  ;;  %s1069_s18 = int_to_ptr.hbm [resolvable:$true] %s1068_s18 }
  0x2e   :  { %711 = vmatpush.bf16.msra.mxu1 %v1163_v10  ;;  %v1615_v48 = vld [vmem:[#allocation5 + $0x264] sm:$0xf0]  ;;  %v1550_v49 = vld [vmem:[#allocation5 + $0x64] sm:$0xf]  ;;  %v1132_v50 = vld [vmem:[#allocation5 + $0x68] sm:$0xf0]  ;;  %v1207_v55 = vor.u32 %v1568_v40, %v1204_v43  ;;  %v1847_v58 = vpack.c.bf16 %v81_v45, %v81_v45 }
  0x2f   :  { %699 = vmatpush.bf16.msra.mxu0 %v1091_v16  ;;  %v84_v53 = vld [vmem:[#allocation2 + $0x18] sm:$0xff]  ;;  %v82_v54 = vld [vmem:[#allocation2 + $0x8] sm:$0xff]  ;;  %v1631_v57 = vld [vmem:[#allocation5 + $0x2e4] sm:$0xf0]  ;;  %v1387_v59 = vor.u32 %v1615_v48, %v1386_v44  ;;  %v1135_v60 = vor.u32 %v1550_v49, %v1132_v50  ;;  %vm1059_vm5 = vcmask 80896  }
  0x30   :  { %725 = vmatpush.bf16.msra.mxu2 %v1219_v20  ;;  %v1450_v56 = vld [vmem:[#allocation5 + $0x2e0] sm:$0xf]  ;;  %v1566_v61 = vld [vmem:[#allocation5 + $0xe4] sm:$0xf]  ;;  %v1196_v62 = vld [vmem:[#allocation5 + $0xe8] sm:$0xf0]  ;;  %v1849_v3 = vpack.c.bf16 %v84_v53, %v84_v53  ;;  %v1851_v4 = vpack.c.bf16 %v82_v54, %v82_v54 }
  0x31   :  { %738 = vmatpush.bf16.msra.mxu3 %v1283_v21  ;;  %v1378_v63 = vld [vmem:[#allocation5 + $0x250] sm:$0xf]  ;;  %v1613_v0 = vld [vmem:[#allocation5 + $0x254] sm:$0xf0]  ;;  %v1548_v1 = vld [vmem:[#allocation5 + $0x54] sm:$0xf]  ;;  %v1451_v5 = vor.u32 %v1631_v57, %v1450_v56  ;;  %v1199_v6 = vor.u32 %v1566_v61, %v1196_v62 }
  0x32   :  { %712 = vmatpush.bf16.msra.mxu1 %v1155_v25  ;;  %v1124_v2 = vld [vmem:[#allocation5 + $0x58] sm:$0xf0]  ;;  %v1442_v7 = vld [vmem:[#allocation5 + $0x2d0] sm:$0xf]  ;;  %v1629_v8 = vld [vmem:[#allocation5 + $0x2d4] sm:$0xf0]  ;;  %v1379_v9 = vor.u32 %v1613_v0, %v1378_v63 }
  0x33   :  { %700 = vmatpush.bf16.msra.mxu0 %v1083_v32  ;;  %v1127_v10 = vor.u32 %v1548_v1, %v1124_v2  ;;  %v1564_v11 = vld [vmem:[#allocation5 + $0xd4] sm:$0xf]  ;;  %v1188_v12 = vld [vmem:[#allocation5 + $0xd8] sm:$0xf0]  ;;  %v1370_v13 = vld [vmem:[#allocation5 + $0x240] sm:$0xf]  ;;  %v1443_v17 = vor.u32 %v1629_v8, %v1442_v7 }
  0x34   :  { %726 = vmatpush.bf16.msra.mxu2 %v1211_v36  ;;  %v1611_v14 = vld [vmem:[#allocation5 + $0x244] sm:$0xf0]  ;;  %v1546_v15 = vld [vmem:[#allocation5 + $0x44] sm:$0xf]  ;;  %v1116_v16 = vld [vmem:[#allocation5 + $0x48] sm:$0xf0]  ;;  %v1191_v18 = vor.u32 %v1564_v11, %v1188_v12 }
  0x35   :  { %739 = vmatpush.bf16.msra.mxu3 %v1275_v37  ;;  %v1434_v19 = vld [vmem:[#allocation5 + $0x2c0] sm:$0xf]  ;;  %v1627_v20 = vld [vmem:[#allocation5 + $0x2c4] sm:$0xf0]  ;;  %v1371_v21 = vor.u32 %v1611_v14, %v1370_v13  ;;  %v1119_v22 = vor.u32 %v1546_v15, %v1116_v16  ;;  %v1562_v23 = vld [vmem:[#allocation5 + $0xc4] sm:$0xf] }
  0x36   :  { %713 = vmatpush.bf16.msra.mxu1 %v1147_v46  ;;  %701 = vmatmul.bf16.vlgmr.msra.gmra.mxu0 %v1847_v58  ;;  %v1180_v24 = vld [vmem:[#allocation5 + $0xc8] sm:$0xf0]  ;;  %v1362_v25 = vld [vmem:[#allocation5 + $0x230] sm:$0xf]  ;;  %v1609_v26 = vld [vmem:[#allocation5 + $0x234] sm:$0xf0]  ;;  %v1435_v29 = vor.u32 %v1627_v20, %v1434_v19 }
  0x37   :  { %745 = vmatpush.bf16.msrb.mxu0 %v1395_v41  ;;  %727 = vmatmul.bf16.vlgmr.msra.gmra.mxu2 %v1845_v51  ;;  %v1544_v27 = vld [vmem:[#allocation5 + $0x34] sm:$0xf]  ;;  %v1108_v28 = vld [vmem:[#allocation5 + $0x38] sm:$0xf0]  ;;  %v1183_v30 = vor.u32 %v1562_v23, %v1180_v24  ;;  %v1426_v31 = vld [vmem:[#allocation5 + $0x2b0] sm:$0xf]  ;;  %v1363_v34 = vor.u32 %v1609_v26, %v1362_v25 }
  0x38   :  { %778 = vmatpush.bf16.msrb.mxu2 %v1467_v47  ;;  %740 = vmatmul.bf16.vlgmr.msra.gmra.mxu3 %v1849_v3  ;;  %v1625_v32 = vld [vmem:[#allocation5 + $0x2b4] sm:$0xf0]  ;;  %v1111_v35 = vor.u32 %v1544_v27, %v1108_v28  ;;  %v1560_v36 = vld [vmem:[#allocation5 + $0xb4] sm:$0xf]  ;;  %v1172_v37 = vld [vmem:[#allocation5 + $0xb8] sm:$0xf0] }
  0x39   :  { %784 = vmatpush.bf16.msrb.mxu3 %v1143_v42  ;;  %714 = vmatmul.bf16.vlgmr.msra.gmra.mxu1 %v1851_v4  ;;  %v87_v33 = vld [vmem:[#allocation2 + $0x30] sm:$0xff]  ;;  %v1354_v38 = vld [vmem:[#allocation5 + $0x220] sm:$0xf]  ;;  %v1607_v39 = vld [vmem:[#allocation5 + $0x224] sm:$0xf0]  ;;  %v1427_v42 = vor.u32 %v1625_v32, %v1426_v31  ;;  %v1175_v44 = vor.u32 %v1560_v36, %v1172_v37 }
  0x3a   :  { %758 = vmatpush.bf16.msrb.mxu1 %v1459_v52  ;;  %v1542_v40 = vld [vmem:[#allocation5 + $0x24] sm:$0xf]  ;;  %v1100_v41 = vld [vmem:[#allocation5 + $0x28] sm:$0xf0]  ;;  %v1857_v43 = vpack.c.bf16 %v87_v33, %v87_v33  ;;  %v1418_v45 = vld [vmem:[#allocation5 + $0x2a0] sm:$0xf]  ;;  %v1355_v47 = vor.u32 %v1607_v39, %v1354_v38 }
  0x3b   :  { %746 = vmatpush.bf16.msrb.mxu0 %v1387_v59  ;;  %v1623_v46 = vld [vmem:[#allocation5 + $0x2a4] sm:$0xf0]  ;;  %v1103_v48 = vor.u32 %v1542_v40, %v1100_v41  ;;  %v1558_v49 = vld [vmem:[#allocation5 + $0xa4] sm:$0xf]  ;;  %v1164_v50 = vld [vmem:[#allocation5 + $0xa8] sm:$0xf0] }
  0x3c   :  { %797 = vmatpush.bf16.msra.mxu2 %v1207_v55  ;;  %v1346_v52 = vld [vmem:[#allocation5 + $0x210] sm:$0xf]  ;;  %v1605_v53 = vld [vmem:[#allocation5 + $0x214] sm:$0xf0]  ;;  %v1540_v54 = vld [vmem:[#allocation5 + $0x14] sm:$0xf]  ;;  %v1419_v56 = vor.u32 %v1623_v46, %v1418_v45  ;;  %v1167_v57 = vor.u32 %v1558_v49, %v1164_v50 }
  0x3d   :  { %785 = vmatpush.bf16.msrb.mxu3 %v1135_v60  ;;  %v1092_v55 = vld [vmem:[#allocation5 + $0x18] sm:$0xf0]  ;;  %v1410_v59 = vld [vmem:[#allocation5 + $0x290] sm:$0xf]  ;;  %v1621_v60 = vld [vmem:[#allocation5 + $0x294] sm:$0xf0]  ;;  %v1347_v62 = vor.u32 %v1605_v53, %v1346_v52 }
  0x3e   :  { %759 = vmatpush.bf16.msrb.mxu1 %v1451_v5  ;;  %v1556_v61 = vld [vmem:[#allocation5 + $0x94] sm:$0xf]  ;;  %v1095_v63 = vor.u32 %v1540_v54, %v1092_v55  ;;  %v1156_v0 = vld [vmem:[#allocation5 + $0x98] sm:$0xf0]  ;;  %v1338_v1 = vld [vmem:[#allocation5 + $0x200] sm:$0xf]  ;;  %v1411_v8 = vor.u32 %v1621_v60, %v1410_v59 }
  0x3f   :  { %747 = vmatpush.bf16.msrb.mxu0 %v1379_v9  ;;  %v1603_v2 = vld [vmem:[#allocation5 + $0x204] sm:$0xf0]  ;;  %v1538_v5 = vld [vmem:[#allocation5 + $0x4] sm:$0xf]  ;;  %v1584_v7 = vld [vmem:[#allocation5 + $0x174] sm:$0xf]  ;;  %v1159_v12 = vor.u32 %v1556_v61, %v1156_v0 }
  0x40   :  { %798 = vmatpush.bf16.msra.mxu2 %v1199_v6  ;;  %v1084_v6 = vld [vmem:[#allocation5 + $0x8] sm:$0xf0]  ;;  %v1268_v9 = vld [vmem:[#allocation5 + $0x178] sm:$0xf0]  ;;  %v1402_v13 = vld [vmem:[#allocation5 + $0x280] sm:$0xf]  ;;  %v1339_v16 = vor.u32 %v1603_v2, %v1338_v1 }
  0x41   :  { %786 = vmatpush.bf16.msrb.mxu3 %v1127_v10  ;;  %v1616_v10 = vld [vmem:[#allocation5 + $0x274] sm:$0xf]  ;;  %v1396_v11 = vld [vmem:[#allocation5 + $0x278] sm:$0xf0]  ;;  %v1619_v14 = vld [vmem:[#allocation5 + $0x284] sm:$0xf0] }
  0x42   :  { %760 = vmatpush.bf16.msrb.mxu1 %v1443_v17  ;;  %v85_v15 = vld [vmem:[#allocation2 + $0x20] sm:$0xff]  ;;  %v1087_v17 = vor.u32 %v1538_v5, %v1084_v6  ;;  %v1600_v20 = vld [vmem:[#allocation5 + $0x1f4] sm:$0xf]  ;;  %v1332_v23 = vld [vmem:[#allocation5 + $0x1f8] sm:$0xf0]  ;;  %v1403_v26 = vor.u32 %v1619_v14, %v1402_v13 }
  0x43   :  { %748 = vmatpush.bf16.msrb.mxu0 %v1371_v21  ;;  %v1148_v19 = vld [vmem:[#allocation5 + $0x88] sm:$0xf0]  ;;  %v1271_v21 = vor.u32 %v1584_v7, %v1268_v9  ;;  %v1632_v24 = vld [vmem:[#allocation5 + $0x2f4] sm:$0xf]  ;;  %v1460_v25 = vld [vmem:[#allocation5 + $0x2f8] sm:$0xf0] }
  0x44   :  { %799 = vmatpush.bf16.msra.mxu2 %v1191_v18  ;;  %v1554_v18 = vld [vmem:[#allocation5 + $0x84] sm:$0xf]  ;;  %v86_v27 = vld [vmem:[#allocation2 + $0x28] sm:$0xff]  ;;  %v1388_v33 = vld [vmem:[#allocation5 + $0x268] sm:$0xf0] }
  0x45   :  { %787 = vmatpush.bf16.msrb.mxu3 %v1119_v22  ;;  %v1399_v22 = vor.u32 %v1616_v10, %v1396_v11  ;;  %v1582_v28 = vld [vmem:[#allocation5 + $0x164] sm:$0xf]  ;;  %v1151_v31 = vor.u32 %v1554_v18, %v1148_v19  ;;  %v1863_v37 = vpack.c.bf16 %v86_v27, %v86_v27  ;;  %v1324_v39 = vld [vmem:[#allocation5 + $0x1e8] sm:$0xf0]  ;;  %v1252_v45 = vld [vmem:[#allocation5 + $0x158] sm:$0xf0] }
  0x46   :  { %761 = vmatpush.bf16.msrb.mxu1 %v1435_v29  ;;  %v1260_v29 = vld [vmem:[#allocation5 + $0x168] sm:$0xf0]  ;;  %v1614_v32 = vld [vmem:[#allocation5 + $0x264] sm:$0xf]  ;;  %v1612_v46 = vld [vmem:[#allocation5 + $0x254] sm:$0xf] }
  0x47   :  { %749 = vmatpush.bf16.msrb.mxu0 %v1363_v34  ;;  %1472 = vmatmul.msk.bf16.vlgmr.msrb.gmra.mxu2 %vm689_vm0, %v1857_v43  ;;  %v1335_v34 = vor.u32 %v1600_v20, %v1332_v23  ;;  %v1598_v36 = vld [vmem:[#allocation5 + $0x1e4] sm:$0xf]  ;;  %v1263_v38 = vor.u32 %v1582_v28, %v1260_v29  ;;  %v1452_v41 = vld [vmem:[#allocation5 + $0x2e8] sm:$0xf0]  ;;  %v1596_v50 = vld [vmem:[#allocation5 + $0x1d4] sm:$0xf] }
  0x48   :  { %800 = vmatpush.bf16.msra.mxu2 %v1183_v30  ;;  %v1861_v30 = vpack.c.bf16 %v85_v15, %v85_v15  ;;  %v1630_v40 = vld [vmem:[#allocation5 + $0x2e4] sm:$0xf]  ;;  %v1316_v53 = vld [vmem:[#allocation5 + $0x1d8] sm:$0xf0]  ;;  %v1628_v54 = vld [vmem:[#allocation5 + $0x2d4] sm:$0xf] }
  0x49   :  { %788 = vmatpush.bf16.msrb.mxu3 %v1111_v35  ;;  %v1463_v35 = vor.u32 %v1632_v24, %v1460_v25  ;;  %v1455_v49 = vor.u32 %v1630_v40, %v1452_v41  ;;  %v1444_v55 = vld [vmem:[#allocation5 + $0x2d8] sm:$0xf0]  ;;  %v1244_v59 = vld [vmem:[#allocation5 + $0x148] sm:$0xf0]  ;;  %v1610_v60 = vld [vmem:[#allocation5 + $0x244] sm:$0xf] }
  0x4a   :  { %762 = vmatpush.bf16.msrb.mxu1 %v1427_v42  ;;  %v1391_v42 = vor.u32 %v1614_v32, %v1388_v33  ;;  %v1372_v61 = vld [vmem:[#allocation5 + $0x248] sm:$0xf0]  ;;  %v1594_v0 = vld [vmem:[#allocation5 + $0x1c4] sm:$0xf]  ;;  %v1236_v9 = vld [vmem:[#allocation5 + $0x138] sm:$0xf0] }
  0x4b   :  { %750 = vmatpush.bf16.msrb.mxu0 %v1355_v47  ;;  %v1380_v47 = vld [vmem:[#allocation5 + $0x258] sm:$0xf0]  ;;  %v1308_v2 = vld [vmem:[#allocation5 + $0x1c8] sm:$0xf0]  ;;  %v1626_v5 = vld [vmem:[#allocation5 + $0x2c4] sm:$0xf]  ;;  %v1375_v7 = vor.u32 %v1610_v60, %v1372_v61 }
  0x4c   :  { %801 = vmatpush.bf16.msra.mxu2 %v1175_v44  ;;  %v1580_v44 = vld [vmem:[#allocation5 + $0x154] sm:$0xf]  ;;  %v1436_v6 = vld [vmem:[#allocation5 + $0x2c8] sm:$0xf0]  ;;  %v1311_v11 = vor.u32 %v1594_v0, %v1308_v2  ;;  %v1300_v14 = vld [vmem:[#allocation5 + $0x1b8] sm:$0xf0] }
  0x4d   :  { %789 = vmatpush.bf16.msrb.mxu3 %v1103_v48  ;;  %v1327_v48 = vor.u32 %v1598_v36, %v1324_v39  ;;  %v1255_v52 = vor.u32 %v1580_v44, %v1252_v45  ;;  %v1608_v10 = vld [vmem:[#allocation5 + $0x234] sm:$0xf]  ;;  %v1574_v18 = vld [vmem:[#allocation5 + $0x124] sm:$0xf]  ;;  %v1228_v19 = vld [vmem:[#allocation5 + $0x128] sm:$0xf0] }
  0x4e   :  { %763 = vmatpush.bf16.msrb.mxu1 %v1419_v56  ;;  %v1383_v56 = vor.u32 %v1612_v46, %v1380_v47  ;;  %v1624_v15 = vld [vmem:[#allocation5 + $0x2b4] sm:$0xf]  ;;  %v1606_v20 = vld [vmem:[#allocation5 + $0x224] sm:$0xf]  ;;  %v1231_v25 = vor.u32 %v1574_v18, %v1228_v19  ;;  %v1420_v28 = vld [vmem:[#allocation5 + $0x2a8] sm:$0xf0] }
  0x4f   :  { %751 = vmatpush.bf16.msrb.mxu0 %v1347_v62  ;;  %v1319_v62 = vor.u32 %v1596_v50, %v1316_v53  ;;  %v1590_v24 = vld [vmem:[#allocation5 + $0x1a4] sm:$0xf]  ;;  %v1220_v32 = vld [vmem:[#allocation5 + $0x118] sm:$0xf0]  ;;  %v1604_v33 = vld [vmem:[#allocation5 + $0x214] sm:$0xf] }
  0x50   :  { %802 = vmatpush.bf16.msra.mxu2 %v1167_v57  ;;  %v1578_v57 = vld [vmem:[#allocation5 + $0x144] sm:$0xf]  ;;  %v1284_v40 = vld [vmem:[#allocation5 + $0x198] sm:$0xf0]  ;;  %v1620_v41 = vld [vmem:[#allocation5 + $0x294] sm:$0xf] }
  0x51   :  { %790 = vmatpush.bf16.msrb.mxu3 %v1095_v63  ;;  %v1447_v63 = vor.u32 %v1628_v54, %v1444_v55  ;;  %v1247_v1 = vor.u32 %v1578_v57, %v1244_v59  ;;  %v1622_v27 = vld [vmem:[#allocation5 + $0x2a4] sm:$0xf]  ;;  %v1212_v46 = vld [vmem:[#allocation5 + $0x108] sm:$0xf0]  ;;  %v1641_v2 = vld [vmem:[#allocation8 + $0x28] sm:$0xff] }
  0x52   :  { %764 = vmatpush.bf16.msrb.mxu1 %v1411_v8  ;;  %v1576_v8 = vld [vmem:[#allocation5 + $0x134] sm:$0xf]  ;;  %v1423_v36 = vor.u32 %v1622_v27, %v1420_v28  ;;  %v1570_v45 = vld [vmem:[#allocation5 + $0x104] sm:$0xf]  ;;  %v1468_v50 = vld [vmem:[#allocation5 + $0x308] sm:$0xf0] }
  0x53   :  { %752 = vmatpush.bf16.msrb.mxu0 %v1339_v16  ;;  %v1239_v13 = vor.u32 %v1576_v8, %v1236_v9  ;;  %v1428_v16 = vld [vmem:[#allocation5 + $0x2b8] sm:$0xf0]  ;;  %v1602_v47 = vld [vmem:[#allocation5 + $0x204] sm:$0xf]  ;;  %v1215_v54 = vor.u32 %v1570_v45, %v1212_v46  ;;  %v1404_v60 = vld [vmem:[#allocation5 + $0x288] sm:$0xf0] }
  0x54   :  { %803 = vmatpush.bf16.msra.mxu2 %v1159_v12  ;;  %v1592_v12 = vld [vmem:[#allocation5 + $0x1b4] sm:$0xf]  ;;  %v1431_v23 = vor.u32 %v1624_v15, %v1428_v16  ;;  %v1586_v55 = vld [vmem:[#allocation5 + $0x184] sm:$0xf]  ;;  %v1643_v0 = vld [vmem:[#allocation8 + $0x38] sm:$0xff] }
  0x55   :  { %791 = vmatpush.bf16.msrb.mxu3 %v1087_v17  ;;  %v1618_v59 = vld [vmem:[#allocation5 + $0x284] sm:$0xf]  ;;  %v1649_v19 = vld [vmem:[#allocation8 + $0x68] sm:$0xff]  ;;  %v1647_v27 = vld [vmem:[#allocation8 + $0x58] sm:$0xff] }
  0x56   :  { %765 = vmatpush.bf16.msrb.mxu1 %v1403_v26  ;;  %753 = vmatmul.bf16.vlgmr.msrb.gmra.mxu0 %v1861_v30  ;;  %v1292_v26 = vld [vmem:[#allocation5 + $0x1a8] sm:$0xf0] }
  0x57   :  { %810 = vmatpush.bf16.msra.mxu0 %v1271_v21  ;;  %v1356_v21 = vld [vmem:[#allocation5 + $0x228] sm:$0xf0] }
  0x58   :  { %804 = vmatpush.bf16.msra.mxu2 %v1151_v31  ;;  %792 = vmatmul.bf16.vlgmr.msrb.gmra.mxu3 %v1847_v58  ;;  %v1439_v58 = vor.u32 %v1626_v5, %v1436_v6  ;;  %v1359_v29 = vor.u32 %v1606_v20, %v1356_v21  ;;  %v1572_v31 = vld [vmem:[#allocation5 + $0x114] sm:$0xf]  ;;  %v1639_v6 = vld [vmem:[#allocation8 + $0x18] sm:$0xff] }
  0x59   :  { %836 = vmatpush.bf16.msra.mxu3 %v1399_v22  ;;  %766 = vmatmul.bf16.vlgmr.msrb.gmra.mxu1 %v1863_v37  ;;  %v1303_v22 = vor.u32 %v1592_v12, %v1300_v14  ;;  %v1223_v39 = vor.u32 %v1572_v31, %v1220_v32  ;;  %v1640_v5 = vld [vmem:[#allocation8 + $0x20] sm:$0xff]  ;;  %v1646_v32 = vld [vmem:[#allocation8 + $0x50] sm:$0xff] }
  0x5a   :  { %823 = vmatpush.bf16.msra.mxu1 %v1335_v34  ;;  %v1348_v34 = vld [vmem:[#allocation5 + $0x218] sm:$0xf0] }
  0x5b   :  { %811 = vmatpush.bf16.msra.mxu0 %v1263_v38  ;;  %805 = vmatmul.bf16.vlgmr.msra.gmra.mxu2 %v1851_v4  ;;  %v1364_v4 = vld [vmem:[#allocation5 + $0x238] sm:$0xf0]  ;;  %v1588_v38 = vld [vmem:[#allocation5 + $0x194] sm:$0xf]  ;;  %v1351_v44 = vor.u32 %v1604_v33, %v1348_v34 }
  0x5c   :  { %849 = vmatpush.bf16.msrb.mxu2 %v1463_v35  ;;  %v1367_v17 = vor.u32 %v1608_v10, %v1364_v4  ;;  %v1295_v35 = vor.u32 %v1590_v24, %v1292_v26  ;;  %v1651_v4 = vld [vmem:[#allocation8 + $0x78] sm:$0xff] }
  0x5d   :  { %837 = vmatpush.bf16.msra.mxu3 %v1391_v42  ;;  %v1412_v42 = vld [vmem:[#allocation5 + $0x298] sm:$0xf0] }
  0x5e   :  { %824 = vmatpush.bf16.msra.mxu1 %v1327_v48  ;;  %v1340_v48 = vld [vmem:[#allocation5 + $0x208] sm:$0xf0]  ;;  %v1415_v53 = vor.u32 %v1620_v41, %v1412_v42 }
  0x5f   :  { %812 = vmatpush.bf16.msra.mxu0 %v1255_v52  ;;  %v1287_v52 = vor.u32 %v1588_v38, %v1284_v40  ;;  %v1343_v57 = vor.u32 %v1602_v47, %v1340_v48  ;;  %v1645_v38 = vld [vmem:[#allocation8 + $0x48] sm:$0xff] }
  0x60   :  { %850 = vmatpush.bf16.msrb.mxu2 %v1455_v49  ;;  %v1634_v49 = vld [vmem:[#allocation5 + $0x304] sm:$0xf] }
  0x61   :  { %838 = vmatpush.bf16.msra.mxu3 %v1383_v56  ;;  %v1276_v56 = vld [vmem:[#allocation5 + $0x188] sm:$0xf0]  ;;  %v1471_v61 = vor.u32 %v1634_v49, %v1468_v50 }
  0x62   :  { %825 = vmatpush.bf16.msra.mxu1 %v1319_v62  ;;  %v1279_v62 = vor.u32 %v1586_v55, %v1276_v56 }
  0x63   :  { %813 = vmatpush.bf16.msra.mxu0 %v1247_v1  ;;  %v1642_v1 = vld [vmem:[#allocation8 + $0x30] sm:$0xff] }
  0x64   :  { %851 = vmatpush.bf16.msrb.mxu2 %v1447_v63  ;;  %v1407_v63 = vor.u32 %v1618_v59, %v1404_v60 }
  0x65   :  { %839 = vmatpush.bf16.msra.mxu3 %v1375_v7 }
  0x66   :  { %826 = vmatpush.bf16.msra.mxu1 %v1311_v11 }
  0x67   :  { %814 = vmatpush.bf16.msra.mxu0 %v1239_v13  ;;  %v1650_v13 = vld [vmem:[#allocation8 + $0x70] sm:$0xff] }
  0x68   :  { %852 = vmatpush.bf16.msrb.mxu2 %v1439_v58 }
  0x69   :  { %840 = vmatpush.bf16.msra.mxu3 %v1367_v17 }
  0x6a   :  { %827 = vmatpush.bf16.msra.mxu1 %v1303_v22  ;;  %v1648_v22 = vld [vmem:[#allocation8 + $0x60] sm:$0xff] }
  0x6b   :  { %815 = vmatpush.bf16.msra.mxu0 %v1231_v25 }
  0x6c   :  { %853 = vmatpush.bf16.msrb.mxu2 %v1431_v23 }
  0x6d   :  { %841 = vmatpush.bf16.msra.mxu3 %v1359_v29 }
  0x6e   :  { %828 = vmatpush.bf16.msra.mxu1 %v1295_v35 }
  0x6f   :  { %816 = vmatpush.bf16.msra.mxu0 %v1223_v39  ;;  %v1644_v39 = vld [vmem:[#allocation8 + $0x40] sm:$0xff] }
  0x70   :  { %854 = vmatpush.bf16.msrb.mxu2 %v1423_v36 }
  0x71   :  { %842 = vmatpush.bf16.msra.mxu3 %v1351_v44 }
  0x72   :  { %829 = vmatpush.bf16.msra.mxu1 %v1287_v52 }
  0x73   :  { %817 = vmatpush.bf16.msra.mxu0 %v1215_v54 }
  0x74   :  { %855 = vmatpush.bf16.msrb.mxu2 %v1415_v53 }
  0x75   :  { %843 = vmatpush.bf16.msra.mxu3 %v1343_v57 }
  0x76   :  { %830 = vmatpush.bf16.msra.mxu1 %v1279_v62  ;;  %818 = vmatmul.bf16.vlgmr.msra.gmra.mxu0 %v1845_v51  ;;  %v1638_v51 = vld [vmem:[#allocation8 + $0x10] sm:$0xff] }
  0x77   :  { %869 = vmatpush.bf16.msrb.mxu0 %v1471_v61 }
  0x78   :  { %844 = vmatmul.bf16.vlgmr.msra.gmra.mxu3 %v1861_v30  ;;  %856 = vmatpush.bf16.msrb.mxu2 %v1407_v63  ;;  %v1637_v30 = vld [vmem:[#allocation8 + $0x8] sm:$0xff] }
  0x79   :  { %831 = vmatmul.bf16.vlgmr.msra.gmra.mxu1 %v1849_v3  ;;  %1024 = vmatpush.bf16.msrb.mxu3 %v1651_v4 }
  0x7a   :  { %1011 = vmatpush.bf16.msrb.mxu1 %v1643_v0 }
  0x7b   :  { %857 = vmatmul.bf16.vlgmr.msrb.gmra.mxu2 %v1863_v37  ;;  %v1636_v37 = vld [vmem:[#allocation8] sm:$0xff] }
  0x7d   :  { %1025 = vmatpush.bf16.msrb.mxu3 %v1650_v13 }
  0x7e   :  { %1012 = vmatpush.bf16.msrb.mxu1 %v1642_v1 }
  0x81   :  { %1026 = vmatpush.bf16.msrb.mxu3 %v1649_v19 }
  0x82   :  { %1013 = vmatpush.bf16.msrb.mxu1 %v1641_v2 }
  0x85   :  { %1027 = vmatpush.bf16.msrb.mxu3 %v1648_v22 }
  0x86   :  { %1473 = vmatmul.msk.bf16.vlgmr.msrb.gmra.mxu0 %vm689_vm0, %v1857_v43  ;;  %1014 = vmatpush.bf16.msrb.mxu1 %v1640_v5  ;;  %v193_v43 = vld [vmem:[#allocation7] sm:$0x3]  ;;  %v1661_v5 = vld [vmem:[%s1885_s4] ss:$0 sm:$0xff]  ;;  %s1802_s4 = smov [#allocation10]  }
  0x87   :  { %v195_v58 = vperm.slane %v193_v43, 0  ;;  %v196_v42 = vperm.slane %v193_v43, 1  ;;  %s1066_s15 = sshll.u32 %s1802_s4, 4  ;;  %s1067_s15 = int_to_ptr.vmem [resolvable:$true] %s1066_s15 }
  0x89   :  { %1028 = vmatpush.bf16.msrb.mxu3 %v1647_v27 }
  0x8a   :  { %1015 = vmatpush.bf16.msrb.mxu1 %v1639_v6 }
  0x8d   :  { %1029 = vmatpush.bf16.msrb.mxu3 %v1646_v32 }
  0x8e   :  { %1016 = vmatpush.bf16.msrb.mxu1 %v1638_v51 }
  0x91   :  { %1030 = vmatpush.bf16.msrb.mxu3 %v1645_v38 }
  0x92   :  { %1017 = vmatpush.bf16.msrb.mxu1 %v1637_v30 }
  0x95   :  { %1031 = vmatpush.bf16.msrb.mxu3 %v1644_v39 }
  0x96   :  { %1018 = vmatpush.bf16.msrb.mxu1 %v1636_v37 }
  0xb3   :  { %v702_v7 = vpop.f32.mrf.mxu0 }
  0xb4   :  { %v703_v14 = vadd.f32 %v702_v7, %v195_v58 }
  0xb6   :  { %v715_v3 = vpop.f32.mrf.mxu1 }
  0xb7   :  { %v716_v16 = vadd.f32 %v715_v3, %v703_v14 }
  0xba   :  { %v728_v8 = vpop.f32.mrf.mxu2 }
  0xbb   :  { %v741_v9 = vpop.f32.mrf.mxu3  ;;  %v704_v10 = vpop.f32.mrf.mxu0  ;;  %v729_v18 = vadd.f32 %v728_v8, %v716_v16 }
  0xbd   :  { %v742_v20 = vadd.f32 %v741_v9, %v729_v18 }
  0xbe   :  { %v717_v11 = vpop.f32.mrf.mxu1 }
  0xc2   :  { %v730_v12 = vpop.f32.mrf.mxu2 }
  0xc3   :  { %v743_v15 = vpop.f32.mrf.mxu3 }
  0xca   :  { %v780_v17 = vpop.f32.mrf.mxu2 }
  0xd2   :  { %v782_v24 = vpop.f32.mrf.mxu2 }
  0xd3   :  { %v754_v21 = vpop.f32.mrf.mxu0 }
  0xd4   :  { %v755_v23 = vadd.f32 %v754_v21, %v742_v20 }
  0xd6   :  { %v767_v25 = vpop.f32.mrf.mxu1 }
  0xd7   :  { %v768_v26 = vadd.f32 %v767_v25, %v755_v23 }
  0xd9   :  { %v781_v28 = vadd.f32 %v780_v17, %v768_v26 }
  0xdb   :  { %v875_v29 = vmax.f32 %v781_v28, 0.0  ;;  %v756_v31 = vpop.f32.mrf.mxu0  ;;  %v793_v35 = vpop.f32.mrf.mxu3 }
  0xdc   :  { %v794_v44 = vadd.f32 %v793_v35, %v196_v42 }
  0xdd   :  { %v877_v33 = vpack.c.bf16 %v875_v29, %v875_v29 }
  0xde   :  { %v806_v34 = vpop.f32.mrf.mxu2  ;;  %v769_v36 = vpop.f32.mrf.mxu1 }
  0xdf   :  { %1019 = vmatmul.bf16.vlgmr.msrb.gmra.mxu1 %v877_v33  ;;  %v807_v46 = vadd.f32 %v806_v34, %v794_v44 }
  0xe3   :  { %v795_v41 = vpop.f32.mrf.mxu3 }
  0xe6   :  { %v808_v40 = vpop.f32.mrf.mxu2 }
  0xf3   :  { %v819_v45 = vpop.f32.mrf.mxu0 }
  0xf4   :  { %v820_v48 = vadd.f32 %v819_v45, %v807_v46 }
  0xf6   :  { %v832_v47 = vpop.f32.mrf.mxu1 }
  0xf7   :  { %v833_v52 = vadd.f32 %v832_v47, %v820_v48 }
  0xfb   :  { %v845_v49 = vpop.f32.mrf.mxu3  ;;  %v821_v50 = vpop.f32.mrf.mxu0 }
  0xfc   :  { %v846_v54 = vadd.f32 %v845_v49, %v833_v52 }
  0xfe   :  { %v858_v53 = vpop.f32.mrf.mxu2  ;;  %v834_v55 = vpop.f32.mrf.mxu1 }
  0xff   :  { %v859_v56 = vadd.f32 %v858_v53, %v846_v54 }
 0x103   :  { %v847_v57 = vpop.f32.mrf.mxu3  ;;  %v871_v59 = vpop.f32.mrf.mxu0 }
 0x104   :  { %v872_v60 = vadd.f32 %v871_v59, %v859_v56 }
 0x106   :  { %v860_v61 = vpop.f32.mrf.mxu2  ;;  %v876_v62 = vmax.f32 %v872_v60, 0.0 }
 0x108   :  { %v878_v63 = vpack.c.bf16 %v876_v62, %v876_v62 }
 0x10a   :  { %1032 = vmatmul.bf16.vlgmr.msrb.gmra.mxu3 %v878_v63 }
 0x10b   :  { %v873_v0 = vpop.f32.mrf.mxu0 }
 0x15c   :  { %v1020_v1 = vpop.f32.mrf.mxu1 }
 0x15d   :  { %v1021_v6 = vadd.f32 %v1661_v5, %v1020_v1 }
 0x164   :  { %v1022_v2 = vpop.f32.mrf.mxu1 }
 0x18d   :  { %v1033_v51 = vpop.f32.mrf.mxu3 }
 0x18e   :  { %v1034_v30 = vadd.f32 %v1033_v51, %v1021_v6 }
 0x190   :  { %1037 = vmax.xlane.f32.xlu0 %v1034_v30 }
 0x195   :  { %v1035_v7 = vpop.f32.mrf.mxu3 }
 0x203   :  { %v1038_v3 = vpop.xlane.xlu0 %1037 }
 0x204   :  { %v1039_v37 = vsub.f32 %v1034_v30, %v1038_v3 }
 0x206   :  { %v1040_v8 = vmul.f32 1.442695, %v1039_v37 }
 0x208   :  { %1662 = vpow2.f32 %v1040_v8 }
 0x20e   :  { %v1663_v43 = vpop.eup %1662 }
 0x20f   :  { %1042 = vadd.xlane.f32.xlu0 %v1663_v43 }
 0x282   :  { %v1043_v9 = vpop.xlane.xlu0 %1042 }
 0x283   :  { %1664 = vrcp.f32 %v1043_v9  ;;  %v1055_v58 = vand.u32 2147483648, %v1043_v9  ;;  %v1053_v13 = vand.u32 2147483647, %v1043_v9  ;;  %vm1049_vm2 = vweird.f32 %v1043_v9 }
 0x285   :  { %v1056_v15 = vor.u32 1.1754944e-38, %v1055_v58  ;;  %vm1054_vm4 = vcmp.eq.f32.partialorder %v1053_v13, 8.507059e+37 }
 0x289   :  { %v1665_v10 = vpop.eup %1664 }
 0x28a   :  { %v1045_v4 = vmul.f32 %v1665_v10, %v1043_v9  ;;  %vm1050_vm1 = vweird.f32 %v1665_v10 }
 0x28b   :  { %vm1051_vm3 = vmor %vm1049_vm2, %vm1050_vm1 }
 0x28c   :  { %v1046_v11 = vsub.f32 1.0, %v1045_v4 }
 0x28e   :  { %v1047_v12 = vmul.f32 %v1665_v10, %v1046_v11 }
 0x290   :  { %v1048_v14 = vadd.f32 %v1665_v10, %v1047_v12 }
 0x292   :  { %v1052_v16 = vsel %vm1051_vm3, %v1665_v10, %v1048_v14 }
 0x293   :  { %v1057_v17 = vsel %vm1054_vm4, %v1056_v15, %v1052_v16 }
 0x294   :  { %v1058_v18 = vmul.f32 %v1663_v43, %v1057_v17 }
 0x296   :  { %1060 = vst.msk [vmem:[#allocation10] sm:$0xff] %vm1059_vm5, %v1058_v18 }
 0x297   :  { %1071 = dma.vmem_to_hbm [thread:$0]  %s1067_s15, 128, %s1069_s18, [#allocation4]  }
 0x298   :  { %1792 = dma.done.wait [#allocation4], 128  }
 0x299   :  { %1793 = vsyncadd [#allocation4], 4294967168 }
 0x29a   :  { %1076 = vsyncpa [#allocation3], 1 }
 0x29b   :  { %1077 = vsyncpa [#allocation6], 1 }
 0x29c   :  { %1078 = vsyncpa [#allocation9], 1 }
 0x29d   :  { %1079 = vsyncpa [#allocation4], 1 }

</bundles_post_ra>
